<compile_context>
chip_gen: v5e
topology: v5e:2x2
jax: 0.10.0
libtpu: 0.0.40
codegen_flags: <defaults>
</compile_context>

<pallas_src>
import numpy as np

import jax
import jax.numpy as jnp
from jax import lax
from jax.experimental import pallas as pl
from jax.experimental.pallas import tpu as pltpu


# ----------------------------------------------------------------------------
# AlignSubNet('avg_pool') as a constant matrix (consecutive windows, last-frame
# repeat padding) — applied inside the kernel as a matmul.
# TODO(synk): MMSA's AlignSubNet view/mean axis order is ambiguous from the
# provided source; consecutive grouping with last-frame padding is used here.
# ----------------------------------------------------------------------------
def _avg_pool_align_matrix(raw_len, dst_len):
    if raw_len == dst_len:
        return np.eye(dst_len, dtype=np.float32)
    pool = raw_len // dst_len if raw_len % dst_len == 0 else raw_len // dst_len + 1
    P = np.zeros((dst_len, raw_len), dtype=np.float32)
    for t in range(dst_len):
        for p in range(pool):
            r = min(t * pool + p, raw_len - 1)   # repeat last frame as padding
            P[t, r] += 1.0 / pool
    return P


def _time_major_gather_matrix(raw_len, dst_len, batch):
    """(dst_len*batch, batch*raw_len): row index = t*B + b (time-major aligned),
    col index = b*raw_len + r (batch-major flattened raw frames)."""
    P = _avg_pool_align_matrix(raw_len, dst_len)
    M = np.zeros((dst_len * batch, batch * raw_len), dtype=np.float32)
    for b in range(batch):
        M[b::batch, b * raw_len:(b + 1) * raw_len] = P
    return M


# ----------------------------------------------------------------------------
# Fused kernel: align + concat + BatchNorm (folded) + LSTM + MLP head.
# ----------------------------------------------------------------------------
def amio_ef_lstm_kernel(
    text_ref, audio_ref, vision_ref,   # (B*T, Dt), (B*Ra, Da), (B*Rv, Dv)  bf16
    pcomb_ref,                         # (T*B, B*T + B*Ra + B*Rv)  bf16, BN scale folded
    wt_ref, wa_ref, wv_ref,            # (Dt, 4H), (Da, 4H), (Dv, 4H)  bf16 (i,f,o,g)
    whh_ref,                           # (H, 4H)  bf16 (i,f,o,g)
    add_ref,                           # (T, 4H)  f32  (BN shift*colsum(W_ih) + b_ih + b_hh)
    wlin_ref, wout_ref,                # (H, H), (H, 1)  bf16
    headb_ref,                         # (1, H+1)  f32  [b_lin | b_out]
    out_ref,                           # (B, 1)  f32
):
    f32 = jnp.float32
    bf16 = jnp.bfloat16
    H = whh_ref.shape[0]
    B = out_ref.shape[0]
    TB = pcomb_ref.shape[0]
    T = TB // B

    def mm(a, b):
        return jnp.dot(a, b, preferred_element_type=f32)

    # --- Lane-dense prologue: per-modality input projections (N = 4H = 128),
    #     then a single combine matmul realizing avg-pool alignment, the
    #     time-major gather, the modality sum and the folded BN scale at once.
    proj = jnp.concatenate(
        [mm(text_ref[...], wt_ref[...]),
         mm(audio_ref[...], wa_ref[...]),
         mm(vision_ref[...], wv_ref[...])], axis=0)          # (B*(T+Ra+Rv), 4H) f32
    pre = mm(pcomb_ref[...], proj.astype(bf16))              # (T*B, 4H) f32, time-major

    whh = whh_ref[...]                                       # bf16, resident in VMEM
    h = jnp.zeros((B, H), f32)
    c = jnp.zeros((B, H), f32)

    # Fully unrolled recurrence (T small & static): concrete-index slices, full
    # scheduler visibility. Gate order after host permutation: i, f, o, g.
    # TODO(synk): pltpu.matmul_push_rhs(whh) once + matmul_acc_lhs/pop per step
    # would keep W_hh in MXU staging; left out pending per-generation validation.
    for t in range(T):
        gates = (pre[t * B:(t + 1) * B, :] + add_ref[t:t + 1, :]
                 + mm(h.astype(bf16), whh))                  # (B, 4H) f32
        sig = jax.nn.sigmoid(gates[:, :3 * H])               # i, f, o  (3H lanes)
        g = jnp.tanh(gates[:, 3 * H:])                       # g        (H lanes)
        i = sig[:, 0:H]
        f = sig[:, H:2 * H]
        o = sig[:, 2 * H:3 * H]
        c = f * c + i * g
        h = o * jnp.tanh(c)

    # Dropout is identity in eval mode; head: ReLU(Linear) -> Linear.
    b_lin = headb_ref[:, :H]
    b_out = headb_ref[:, H:H + 1]
    z = jnp.maximum(mm(h.astype(bf16), wlin_ref[...]) + b_lin, 0.0)
    out_ref[...] = mm(z.astype(bf16), wout_ref[...]) + b_out


# ----------------------------------------------------------------------------
# AMIO wrapper (need_model_aligned=True, model_name='A11_EF_LSTM')
# ----------------------------------------------------------------------------
def amio_forward(params, text_x, audio_x, vision_x):
    B, T, Dt = text_x.shape                   # AlignSubNet.get_seq_len() == text len
    _, Ra, Da = audio_x.shape
    _, Rv, Dv = vision_x.shape
    H = params["w_hh"].shape[0]
    G = 4 * H
    f32, bf16 = jnp.float32, jnp.bfloat16

    # Gate-column permutation: PyTorch (i, f, g, o) -> kernel (i, f, o, g) so the
    # sigmoid block is contiguous in the first 3H lanes and tanh in the last H.
    perm = np.concatenate([np.arange(0, H), np.arange(H, 2 * H),
                           np.arange(3 * H, 4 * H), np.arange(2 * H, 3 * H)])

    w_ih_t = params["w_ih_t"][:, perm]
    w_ih_a = params["w_ih_a"][:, perm]
    w_ih_v = params["w_ih_v"][:, perm]
    w_hh = params["w_hh"][:, perm]

    # Fold BatchNorm1d(num_features=T), eval mode, into the gate pre-activation:
    #   xn = scale_t * x + shift_t  (broadcast over batch & features)
    #   xn @ W_ih + b = scale_t * (x @ W_ih) + shift_t * colsum(W_ih) + b
    eps = 1e-5
    scale = params["bn_gamma"] * lax.rsqrt(params["bn_var"] + eps)            # (T,)
    shift = params["bn_beta"] - params["bn_mean"] * scale                     # (T,)
    wcol = w_ih_t.sum(0) + w_ih_a.sum(0) + w_ih_v.sum(0)                      # (4H,)
    bias = (params["b_ih"] + params["b_hh"])[perm].reshape(1, G)              # (1,4H)
    add = (shift[:, None] * wcol[None, :] + bias).astype(f32)                 # (T,4H)

    # One packed alignment/gather constant (text | audio | vision columns) with
    # the BN scale folded into its rows (exact affine fold, rows = t*B + b).
    p_np = np.concatenate([_time_major_gather_matrix(T, T, B),
                           _time_major_gather_matrix(Ra, T, B),
                           _time_major_gather_matrix(Rv, T, B)], axis=1)
    p_comb = (jnp.repeat(scale, B)[:, None] * jnp.asarray(p_np)).astype(bf16)

    head_b = jnp.concatenate([params["b_lin"], params["b_out"]],
                             axis=1).astype(f32)                              # (1,H+1)

    # Contiguous leading-dim flattens only (no transposes / concats / pooling of
    # activations outside the kernel).
    args = (
        text_x.reshape(B * T, Dt).astype(bf16),
        audio_x.reshape(B * Ra, Da).astype(bf16),
        vision_x.reshape(B * Rv, Dv).astype(bf16),
        p_comb,
        w_ih_t.astype(bf16), w_ih_a.astype(bf16), w_ih_v.astype(bf16),
        w_hh.astype(bf16),
        add,
        params["w_lin"].astype(bf16), params["w_out"].astype(bf16),
        head_b,
    )

    def mmf(m, k, n):
        return 2 * m * k * n
    r_sum = B * T + B * Ra + B * Rv
    flops = (mmf(B * T, Dt, G) + mmf(B * Ra, Da, G) + mmf(B * Rv, Dv, G)
             + mmf(T * B, r_sum, G)
             + T * mmf(B, H, G) + mmf(B, H, H) + mmf(B, H, 1))
    transcendentals = T * B * (3 * H + 2 * H)
    bytes_accessed = sum(int(a.size) * a.dtype.itemsize for a in args) + B * 4

    vmem = pl.BlockSpec(memory_space=pltpu.MemorySpace.VMEM)
    return pl.pallas_call(
        amio_ef_lstm_kernel,
        out_shape=jax.ShapeDtypeStruct((B, 1), jnp.float32),
        in_specs=[vmem] * len(args),
        out_specs=vmem,
        cost_estimate=pl.CostEstimate(flops=flops,
                                      transcendentals=transcendentals,
                                      bytes_accessed=bytes_accessed),
    )(*args)


def init_params(key, seq_len, d_text, d_audio, d_vision, hidden):
    ks = jax.random.split(key, 12)
    u = 1.0 / float(np.sqrt(hidden))

    def unif(k, shape, scale):
        return jax.random.uniform(k, shape, jnp.float32, -scale, scale)

    return {
        # BatchNorm1d(seq_len) — deterministic, non-trivial eval-mode stats.
        "bn_gamma": 1.0 + 0.05 * jnp.arange(seq_len, dtype=jnp.float32),
        "bn_beta": 0.02 * jnp.arange(seq_len, dtype=jnp.float32),
        "bn_mean": 0.1 * jax.random.normal(ks[0], (seq_len,), jnp.float32),
        "bn_var": 1.0 + 0.1 * jax.random.uniform(ks[1], (seq_len,), jnp.float32),
        # LSTM input weights, split by modality (rows of W_ih), pre-transposed
        # for x @ W layout; canonical PyTorch gate order i,f,g,o along 4H.
        "w_ih_t": unif(ks[2], (d_text, 4 * hidden), u),
        "w_ih_a": unif(ks[3], (d_audio, 4 * hidden), u),
        "w_ih_v": unif(ks[4], (d_vision, 4 * hidden), u),
        "w_hh": unif(ks[5], (hidden, 4 * hidden), u),
        "b_ih": unif(ks[6], (4 * hidden,), u),
        "b_hh": unif(ks[7], (4 * hidden,), u),
        # Linear(hidden, hidden) and Linear(hidden, 1), pre-transposed.
        "w_lin": unif(ks[8], (hidden, hidden), u),
        "b_lin": unif(ks[9], (1, hidden), u),
        "w_out": unif(ks[10], (hidden, 1), u),
        "b_out": unif(ks[11], (1, 1), u),
    }


if __name__ == "__main__":
    key = jax.random.PRNGKey(0)
    k_t, k_a, k_v, k_p = jax.random.split(key, 4)

    B = 2
    T_text, D_text = 8, 16
    T_audio, D_audio = 20, 8      # aligned 20 -> 8 (pool 3, last-frame pad)
    T_vis, D_vis = 16, 8          # aligned 16 -> 8 (pool 2)
    HIDDEN = 32

    text_x = jax.random.normal(k_t, (B, T_text, D_text), jnp.float32)
    audio_x = jax.random.normal(k_a, (B, T_audio, D_audio), jnp.float32)
    vision_x = jax.random.normal(k_v, (B, T_vis, D_vis), jnp.float32)

    params = init_params(k_p, T_text, D_text, D_audio, D_vis, HIDDEN)

    fwd = jax.jit(amio_forward)
    out = fwd(params, text_x, audio_x, vision_x)   # (B, 1) == result dict's 'M'
    jax.block_until_ready(out)
    assert out.shape == (B, 1) and out.dtype == jnp.float32
    print("KERNEL_OK")
</pallas_src>

<mosaic_0001>
module attributes {stable_mosaic.version = 11 : i64} {
  func.func @amio_ef_lstm_kernel(%arg0: memref<16x16xbf16, #tpu.memory_space<vmem>>, %arg1: memref<40x8xbf16, #tpu.memory_space<vmem>>, %arg2: memref<32x8xbf16, #tpu.memory_space<vmem>>, %arg3: memref<16x88xbf16, #tpu.memory_space<vmem>>, %arg4: memref<16x128xbf16, #tpu.memory_space<vmem>>, %arg5: memref<8x128xbf16, #tpu.memory_space<vmem>>, %arg6: memref<8x128xbf16, #tpu.memory_space<vmem>>, %arg7: memref<32x128xbf16, #tpu.memory_space<vmem>>, %arg8: memref<8x128xf32, #tpu.memory_space<vmem>>, %arg9: memref<32x32xbf16, #tpu.memory_space<vmem>>, %arg10: memref<32x1xbf16, #tpu.memory_space<vmem>>, %arg11: memref<1x33xf32, #tpu.memory_space<vmem>>, %arg12: memref<2x1xf32, #tpu.memory_space<vmem>>) attributes {dimension_semantics = [], scalar_prefetch = 0 : i64, scratch_operands = 0 : i64, tpu.core_type = #tpu.core_type<tc>} {
    %c0 = arith.constant 0 : index
    %c0_0 = arith.constant 0 : index
    %0 = vector.load %arg0[%c0, %c0_0] : memref<16x16xbf16, #tpu.memory_space<vmem>>, vector<16x16xbf16>
    %c0_1 = arith.constant 0 : index
    %c0_2 = arith.constant 0 : index
    %1 = vector.load %arg4[%c0_1, %c0_2] : memref<16x128xbf16, #tpu.memory_space<vmem>>, vector<16x128xbf16>
    %cst = arith.constant dense<0.000000e+00> : vector<16x128xf32>
    %2 = tpu.matmul %0, %1, %cst {dimension_numbers = #tpu.dot_dimension_numbers<[1], [0], [0], [1], [0, 0, 1, 1], [], []>} : vector<16x16xbf16>, vector<16x128xbf16>, vector<16x128xf32> -> vector<16x128xf32>
    %c0_3 = arith.constant 0 : index
    %c0_4 = arith.constant 0 : index
    %3 = vector.load %arg1[%c0_3, %c0_4] : memref<40x8xbf16, #tpu.memory_space<vmem>>, vector<40x8xbf16>
    %c0_5 = arith.constant 0 : index
    %c0_6 = arith.constant 0 : index
    %4 = vector.load %arg5[%c0_5, %c0_6] : memref<8x128xbf16, #tpu.memory_space<vmem>>, vector<8x128xbf16>
    %cst_7 = arith.constant dense<0.000000e+00> : vector<40x128xf32>
    %5 = tpu.matmul %3, %4, %cst_7 {dimension_numbers = #tpu.dot_dimension_numbers<[1], [0], [0], [1], [0, 0, 1, 1], [], []>} : vector<40x8xbf16>, vector<8x128xbf16>, vector<40x128xf32> -> vector<40x128xf32>
    %c0_8 = arith.constant 0 : index
    %c0_9 = arith.constant 0 : index
    %6 = vector.load %arg2[%c0_8, %c0_9] : memref<32x8xbf16, #tpu.memory_space<vmem>>, vector<32x8xbf16>
    %c0_10 = arith.constant 0 : index
    %c0_11 = arith.constant 0 : index
    %7 = vector.load %arg6[%c0_10, %c0_11] : memref<8x128xbf16, #tpu.memory_space<vmem>>, vector<8x128xbf16>
    %cst_12 = arith.constant dense<0.000000e+00> : vector<32x128xf32>
    %8 = tpu.matmul %6, %7, %cst_12 {dimension_numbers = #tpu.dot_dimension_numbers<[1], [0], [0], [1], [0, 0, 1, 1], [], []>} : vector<32x8xbf16>, vector<8x128xbf16>, vector<32x128xf32> -> vector<32x128xf32>
    %9 = tpu.concatenate %2, %5, %8 in 0 : vector<16x128xf32>, vector<40x128xf32>, vector<32x128xf32> -> vector<88x128xf32>
    %c0_13 = arith.constant 0 : index
    %c0_14 = arith.constant 0 : index
    %10 = vector.load %arg3[%c0_13, %c0_14] : memref<16x88xbf16, #tpu.memory_space<vmem>>, vector<16x88xbf16>
    %11 = arith.truncf %9 : vector<88x128xf32> to vector<88x128xbf16>
    %cst_15 = arith.constant dense<0.000000e+00> : vector<16x128xf32>
    %12 = tpu.matmul %10, %11, %cst_15 {dimension_numbers = #tpu.dot_dimension_numbers<[1], [0], [0], [1], [0, 0, 1, 1], [], []>} : vector<16x88xbf16>, vector<88x128xbf16>, vector<16x128xf32> -> vector<16x128xf32>
    %c0_16 = arith.constant 0 : index
    %c0_17 = arith.constant 0 : index
    %13 = vector.load %arg7[%c0_16, %c0_17] : memref<32x128xbf16, #tpu.memory_space<vmem>>, vector<32x128xbf16>
    %cst_18 = arith.constant 0.000000e+00 : f32
    %14 = vector.broadcast %cst_18 : f32 to vector<2x32xf32>
    %cst_19 = arith.constant 0.000000e+00 : f32
    %15 = vector.broadcast %cst_19 : f32 to vector<2x32xf32>
    %16 = vector.extract_strided_slice %12 {offsets = [0, 0], sizes = [2, 128], strides = [1, 1]} : vector<16x128xf32> to vector<2x128xf32>
    %c0_20 = arith.constant 0 : index
    %c0_21 = arith.constant 0 : index
    %17 = vector.load %arg8[%c0_20, %c0_21] : memref<8x128xf32, #tpu.memory_space<vmem>>, vector<1x128xf32>
    %18 = vector.broadcast %17 : vector<1x128xf32> to vector<2x128xf32>
    %19 = arith.addf %16, %18 : vector<2x128xf32>
    %20 = arith.truncf %14 : vector<2x32xf32> to vector<2x32xbf16>
    %cst_22 = arith.constant dense<0.000000e+00> : vector<2x128xf32>
    %21 = tpu.matmul %20, %13, %cst_22 {dimension_numbers = #tpu.dot_dimension_numbers<[1], [0], [0], [1], [0, 0, 1, 1], [], []>} : vector<2x32xbf16>, vector<32x128xbf16>, vector<2x128xf32> -> vector<2x128xf32>
    %22 = arith.addf %19, %21 : vector<2x128xf32>
    %23 = vector.extract_strided_slice %22 {offsets = [0, 0], sizes = [2, 96], strides = [1, 1]} : vector<2x128xf32> to vector<2x96xf32>
    %24 = arith.negf %23 : vector<2x96xf32>
    %25 = math.exp %24 : vector<2x96xf32>
    %cst_23 = arith.constant 1.000000e+00 : f32
    %26 = vector.broadcast %cst_23 : f32 to vector<2x96xf32>
    %27 = arith.addf %26, %25 : vector<2x96xf32>
    %28 = arith.divf %26, %27 : vector<2x96xf32>
    %29 = vector.extract_strided_slice %22 {offsets = [0, 96], sizes = [2, 32], strides = [1, 1]} : vector<2x128xf32> to vector<2x32xf32>
    %30 = math.tanh %29 : vector<2x32xf32>
    %31 = vector.extract_strided_slice %28 {offsets = [0, 0], sizes = [2, 32], strides = [1, 1]} : vector<2x96xf32> to vector<2x32xf32>
    %32 = vector.extract_strided_slice %28 {offsets = [0, 32], sizes = [2, 32], strides = [1, 1]} : vector<2x96xf32> to vector<2x32xf32>
    %33 = vector.extract_strided_slice %28 {offsets = [0, 64], sizes = [2, 32], strides = [1, 1]} : vector<2x96xf32> to vector<2x32xf32>
    %34 = arith.mulf %32, %15 : vector<2x32xf32>
    %35 = arith.mulf %31, %30 : vector<2x32xf32>
    %36 = arith.addf %34, %35 : vector<2x32xf32>
    %37 = math.tanh %36 : vector<2x32xf32>
    %38 = arith.mulf %33, %37 : vector<2x32xf32>
    %39 = vector.extract_strided_slice %12 {offsets = [2, 0], sizes = [2, 128], strides = [1, 1]} : vector<16x128xf32> to vector<2x128xf32>
    %c1 = arith.constant 1 : index
    %c0_24 = arith.constant 0 : index
    %40 = vector.load %arg8[%c1, %c0_24] : memref<8x128xf32, #tpu.memory_space<vmem>>, vector<1x128xf32>
    %41 = vector.broadcast %40 : vector<1x128xf32> to vector<2x128xf32>
    %42 = arith.addf %39, %41 : vector<2x128xf32>
    %43 = arith.truncf %38 : vector<2x32xf32> to vector<2x32xbf16>
    %cst_25 = arith.constant dense<0.000000e+00> : vector<2x128xf32>
    %44 = tpu.matmul %43, %13, %cst_25 {dimension_numbers = #tpu.dot_dimension_numbers<[1], [0], [0], [1], [0, 0, 1, 1], [], []>} : vector<2x32xbf16>, vector<32x128xbf16>, vector<2x128xf32> -> vector<2x128xf32>
    %45 = arith.addf %42, %44 : vector<2x128xf32>
    %46 = vector.extract_strided_slice %45 {offsets = [0, 0], sizes = [2, 96], strides = [1, 1]} : vector<2x128xf32> to vector<2x96xf32>
    %47 = arith.negf %46 : vector<2x96xf32>
    %48 = math.exp %47 : vector<2x96xf32>
    %cst_26 = arith.constant 1.000000e+00 : f32
    %49 = vector.broadcast %cst_26 : f32 to vector<2x96xf32>
    %50 = arith.addf %49, %48 : vector<2x96xf32>
    %51 = arith.divf %49, %50 : vector<2x96xf32>
    %52 = vector.extract_strided_slice %45 {offsets = [0, 96], sizes = [2, 32], strides = [1, 1]} : vector<2x128xf32> to vector<2x32xf32>
    %53 = math.tanh %52 : vector<2x32xf32>
    %54 = vector.extract_strided_slice %51 {offsets = [0, 0], sizes = [2, 32], strides = [1, 1]} : vector<2x96xf32> to vector<2x32xf32>
    %55 = vector.extract_strided_slice %51 {offsets = [0, 32], sizes = [2, 32], strides = [1, 1]} : vector<2x96xf32> to vector<2x32xf32>
    %56 = vector.extract_strided_slice %51 {offsets = [0, 64], sizes = [2, 32], strides = [1, 1]} : vector<2x96xf32> to vector<2x32xf32>
    %57 = arith.mulf %55, %36 : vector<2x32xf32>
    %58 = arith.mulf %54, %53 : vector<2x32xf32>
    %59 = arith.addf %57, %58 : vector<2x32xf32>
    %60 = math.tanh %59 : vector<2x32xf32>
    %61 = arith.mulf %56, %60 : vector<2x32xf32>
    %62 = vector.extract_strided_slice %12 {offsets = [4, 0], sizes = [2, 128], strides = [1, 1]} : vector<16x128xf32> to vector<2x128xf32>
    %c2 = arith.constant 2 : index
    %c0_27 = arith.constant 0 : index
    %63 = vector.load %arg8[%c2, %c0_27] : memref<8x128xf32, #tpu.memory_space<vmem>>, vector<1x128xf32>
    %64 = vector.broadcast %63 : vector<1x128xf32> to vector<2x128xf32>
    %65 = arith.addf %62, %64 : vector<2x128xf32>
    %66 = arith.truncf %61 : vector<2x32xf32> to vector<2x32xbf16>
    %cst_28 = arith.constant dense<0.000000e+00> : vector<2x128xf32>
    %67 = tpu.matmul %66, %13, %cst_28 {dimension_numbers = #tpu.dot_dimension_numbers<[1], [0], [0], [1], [0, 0, 1, 1], [], []>} : vector<2x32xbf16>, vector<32x128xbf16>, vector<2x128xf32> -> vector<2x128xf32>
    %68 = arith.addf %65, %67 : vector<2x128xf32>
    %69 = vector.extract_strided_slice %68 {offsets = [0, 0], sizes = [2, 96], strides = [1, 1]} : vector<2x128xf32> to vector<2x96xf32>
    %70 = arith.negf %69 : vector<2x96xf32>
    %71 = math.exp %70 : vector<2x96xf32>
    %cst_29 = arith.constant 1.000000e+00 : f32
    %72 = vector.broadcast %cst_29 : f32 to vector<2x96xf32>
    %73 = arith.addf %72, %71 : vector<2x96xf32>
    %74 = arith.divf %72, %73 : vector<2x96xf32>
    %75 = vector.extract_strided_slice %68 {offsets = [0, 96], sizes = [2, 32], strides = [1, 1]} : vector<2x128xf32> to vector<2x32xf32>
    %76 = math.tanh %75 : vector<2x32xf32>
    %77 = vector.extract_strided_slice %74 {offsets = [0, 0], sizes = [2, 32], strides = [1, 1]} : vector<2x96xf32> to vector<2x32xf32>
    %78 = vector.extract_strided_slice %74 {offsets = [0, 32], sizes = [2, 32], strides = [1, 1]} : vector<2x96xf32> to vector<2x32xf32>
    %79 = vector.extract_strided_slice %74 {offsets = [0, 64], sizes = [2, 32], strides = [1, 1]} : vector<2x96xf32> to vector<2x32xf32>
    %80 = arith.mulf %78, %59 : vector<2x32xf32>
    %81 = arith.mulf %77, %76 : vector<2x32xf32>
    %82 = arith.addf %80, %81 : vector<2x32xf32>
    %83 = math.tanh %82 : vector<2x32xf32>
    %84 = arith.mulf %79, %83 : vector<2x32xf32>
    %85 = vector.extract_strided_slice %12 {offsets = [6, 0], sizes = [2, 128], strides = [1, 1]} : vector<16x128xf32> to vector<2x128xf32>
    %c3 = arith.constant 3 : index
    %c0_30 = arith.constant 0 : index
    %86 = vector.load %arg8[%c3, %c0_30] : memref<8x128xf32, #tpu.memory_space<vmem>>, vector<1x128xf32>
    %87 = vector.broadcast %86 : vector<1x128xf32> to vector<2x128xf32>
    %88 = arith.addf %85, %87 : vector<2x128xf32>
    %89 = arith.truncf %84 : vector<2x32xf32> to vector<2x32xbf16>
    %cst_31 = arith.constant dense<0.000000e+00> : vector<2x128xf32>
    %90 = tpu.matmul %89, %13, %cst_31 {dimension_numbers = #tpu.dot_dimension_numbers<[1], [0], [0], [1], [0, 0, 1, 1], [], []>} : vector<2x32xbf16>, vector<32x128xbf16>, vector<2x128xf32> -> vector<2x128xf32>
    %91 = arith.addf %88, %90 : vector<2x128xf32>
    %92 = vector.extract_strided_slice %91 {offsets = [0, 0], sizes = [2, 96], strides = [1, 1]} : vector<2x128xf32> to vector<2x96xf32>
    %93 = arith.negf %92 : vector<2x96xf32>
    %94 = math.exp %93 : vector<2x96xf32>
    %cst_32 = arith.constant 1.000000e+00 : f32
    %95 = vector.broadcast %cst_32 : f32 to vector<2x96xf32>
    %96 = arith.addf %95, %94 : vector<2x96xf32>
    %97 = arith.divf %95, %96 : vector<2x96xf32>
    %98 = vector.extract_strided_slice %91 {offsets = [0, 96], sizes = [2, 32], strides = [1, 1]} : vector<2x128xf32> to vector<2x32xf32>
    %99 = math.tanh %98 : vector<2x32xf32>
    %100 = vector.extract_strided_slice %97 {offsets = [0, 0], sizes = [2, 32], strides = [1, 1]} : vector<2x96xf32> to vector<2x32xf32>
    %101 = vector.extract_strided_slice %97 {offsets = [0, 32], sizes = [2, 32], strides = [1, 1]} : vector<2x96xf32> to vector<2x32xf32>
    %102 = vector.extract_strided_slice %97 {offsets = [0, 64], sizes = [2, 32], strides = [1, 1]} : vector<2x96xf32> to vector<2x32xf32>
    %103 = arith.mulf %101, %82 : vector<2x32xf32>
    %104 = arith.mulf %100, %99 : vector<2x32xf32>
    %105 = arith.addf %103, %104 : vector<2x32xf32>
    %106 = math.tanh %105 : vector<2x32xf32>
    %107 = arith.mulf %102, %106 : vector<2x32xf32>
    %108 = vector.extract_strided_slice %12 {offsets = [8, 0], sizes = [2, 128], strides = [1, 1]} : vector<16x128xf32> to vector<2x128xf32>
    %c4 = arith.constant 4 : index
    %c0_33 = arith.constant 0 : index
    %109 = vector.load %arg8[%c4, %c0_33] : memref<8x128xf32, #tpu.memory_space<vmem>>, vector<1x128xf32>
    %110 = vector.broadcast %109 : vector<1x128xf32> to vector<2x128xf32>
    %111 = arith.addf %108, %110 : vector<2x128xf32>
    %112 = arith.truncf %107 : vector<2x32xf32> to vector<2x32xbf16>
    %cst_34 = arith.constant dense<0.000000e+00> : vector<2x128xf32>
    %113 = tpu.matmul %112, %13, %cst_34 {dimension_numbers = #tpu.dot_dimension_numbers<[1], [0], [0], [1], [0, 0, 1, 1], [], []>} : vector<2x32xbf16>, vector<32x128xbf16>, vector<2x128xf32> -> vector<2x128xf32>
    %114 = arith.addf %111, %113 : vector<2x128xf32>
    %115 = vector.extract_strided_slice %114 {offsets = [0, 0], sizes = [2, 96], strides = [1, 1]} : vector<2x128xf32> to vector<2x96xf32>
    %116 = arith.negf %115 : vector<2x96xf32>
    %117 = math.exp %116 : vector<2x96xf32>
    %cst_35 = arith.constant 1.000000e+00 : f32
    %118 = vector.broadcast %cst_35 : f32 to vector<2x96xf32>
    %119 = arith.addf %118, %117 : vector<2x96xf32>
    %120 = arith.divf %118, %119 : vector<2x96xf32>
    %121 = vector.extract_strided_slice %114 {offsets = [0, 96], sizes = [2, 32], strides = [1, 1]} : vector<2x128xf32> to vector<2x32xf32>
    %122 = math.tanh %121 : vector<2x32xf32>
    %123 = vector.extract_strided_slice %120 {offsets = [0, 0], sizes = [2, 32], strides = [1, 1]} : vector<2x96xf32> to vector<2x32xf32>
    %124 = vector.extract_strided_slice %120 {offsets = [0, 32], sizes = [2, 32], strides = [1, 1]} : vector<2x96xf32> to vector<2x32xf32>
    %125 = vector.extract_strided_slice %120 {offsets = [0, 64], sizes = [2, 32], strides = [1, 1]} : vector<2x96xf32> to vector<2x32xf32>
    %126 = arith.mulf %124, %105 : vector<2x32xf32>
    %127 = arith.mulf %123, %122 : vector<2x32xf32>
    %128 = arith.addf %126, %127 : vector<2x32xf32>
    %129 = math.tanh %128 : vector<2x32xf32>
    %130 = arith.mulf %125, %129 : vector<2x32xf32>
    %131 = vector.extract_strided_slice %12 {offsets = [10, 0], sizes = [2, 128], strides = [1, 1]} : vector<16x128xf32> to vector<2x128xf32>
    %c5 = arith.constant 5 : index
    %c0_36 = arith.constant 0 : index
    %132 = vector.load %arg8[%c5, %c0_36] : memref<8x128xf32, #tpu.memory_space<vmem>>, vector<1x128xf32>
    %133 = vector.broadcast %132 : vector<1x128xf32> to vector<2x128xf32>
    %134 = arith.addf %131, %133 : vector<2x128xf32>
    %135 = arith.truncf %130 : vector<2x32xf32> to vector<2x32xbf16>
    %cst_37 = arith.constant dense<0.000000e+00> : vector<2x128xf32>
    %136 = tpu.matmul %135, %13, %cst_37 {dimension_numbers = #tpu.dot_dimension_numbers<[1], [0], [0], [1], [0, 0, 1, 1], [], []>} : vector<2x32xbf16>, vector<32x128xbf16>, vector<2x128xf32> -> vector<2x128xf32>
    %137 = arith.addf %134, %136 : vector<2x128xf32>
    %138 = vector.extract_strided_slice %137 {offsets = [0, 0], sizes = [2, 96], strides = [1, 1]} : vector<2x128xf32> to vector<2x96xf32>
    %139 = arith.negf %138 : vector<2x96xf32>
    %140 = math.exp %139 : vector<2x96xf32>
    %cst_38 = arith.constant 1.000000e+00 : f32
    %141 = vector.broadcast %cst_38 : f32 to vector<2x96xf32>
    %142 = arith.addf %141, %140 : vector<2x96xf32>
    %143 = arith.divf %141, %142 : vector<2x96xf32>
    %144 = vector.extract_strided_slice %137 {offsets = [0, 96], sizes = [2, 32], strides = [1, 1]} : vector<2x128xf32> to vector<2x32xf32>
    %145 = math.tanh %144 : vector<2x32xf32>
    %146 = vector.extract_strided_slice %143 {offsets = [0, 0], sizes = [2, 32], strides = [1, 1]} : vector<2x96xf32> to vector<2x32xf32>
    %147 = vector.extract_strided_slice %143 {offsets = [0, 32], sizes = [2, 32], strides = [1, 1]} : vector<2x96xf32> to vector<2x32xf32>
    %148 = vector.extract_strided_slice %143 {offsets = [0, 64], sizes = [2, 32], strides = [1, 1]} : vector<2x96xf32> to vector<2x32xf32>
    %149 = arith.mulf %147, %128 : vector<2x32xf32>
    %150 = arith.mulf %146, %145 : vector<2x32xf32>
    %151 = arith.addf %149, %150 : vector<2x32xf32>
    %152 = math.tanh %151 : vector<2x32xf32>
    %153 = arith.mulf %148, %152 : vector<2x32xf32>
    %154 = vector.extract_strided_slice %12 {offsets = [12, 0], sizes = [2, 128], strides = [1, 1]} : vector<16x128xf32> to vector<2x128xf32>
    %c6 = arith.constant 6 : index
    %c0_39 = arith.constant 0 : index
    %155 = vector.load %arg8[%c6, %c0_39] : memref<8x128xf32, #tpu.memory_space<vmem>>, vector<1x128xf32>
    %156 = vector.broadcast %155 : vector<1x128xf32> to vector<2x128xf32>
    %157 = arith.addf %154, %156 : vector<2x128xf32>
    %158 = arith.truncf %153 : vector<2x32xf32> to vector<2x32xbf16>
    %cst_40 = arith.constant dense<0.000000e+00> : vector<2x128xf32>
    %159 = tpu.matmul %158, %13, %cst_40 {dimension_numbers = #tpu.dot_dimension_numbers<[1], [0], [0], [1], [0, 0, 1, 1], [], []>} : vector<2x32xbf16>, vector<32x128xbf16>, vector<2x128xf32> -> vector<2x128xf32>
    %160 = arith.addf %157, %159 : vector<2x128xf32>
    %161 = vector.extract_strided_slice %160 {offsets = [0, 0], sizes = [2, 96], strides = [1, 1]} : vector<2x128xf32> to vector<2x96xf32>
    %162 = arith.negf %161 : vector<2x96xf32>
    %163 = math.exp %162 : vector<2x96xf32>
    %cst_41 = arith.constant 1.000000e+00 : f32
    %164 = vector.broadcast %cst_41 : f32 to vector<2x96xf32>
    %165 = arith.addf %164, %163 : vector<2x96xf32>
    %166 = arith.divf %164, %165 : vector<2x96xf32>
    %167 = vector.extract_strided_slice %160 {offsets = [0, 96], sizes = [2, 32], strides = [1, 1]} : vector<2x128xf32> to vector<2x32xf32>
    %168 = math.tanh %167 : vector<2x32xf32>
    %169 = vector.extract_strided_slice %166 {offsets = [0, 0], sizes = [2, 32], strides = [1, 1]} : vector<2x96xf32> to vector<2x32xf32>
    %170 = vector.extract_strided_slice %166 {offsets = [0, 32], sizes = [2, 32], strides = [1, 1]} : vector<2x96xf32> to vector<2x32xf32>
    %171 = vector.extract_strided_slice %166 {offsets = [0, 64], sizes = [2, 32], strides = [1, 1]} : vector<2x96xf32> to vector<2x32xf32>
    %172 = arith.mulf %170, %151 : vector<2x32xf32>
    %173 = arith.mulf %169, %168 : vector<2x32xf32>
    %174 = arith.addf %172, %173 : vector<2x32xf32>
    %175 = math.tanh %174 : vector<2x32xf32>
    %176 = arith.mulf %171, %175 : vector<2x32xf32>
    %177 = vector.extract_strided_slice %12 {offsets = [14, 0], sizes = [2, 128], strides = [1, 1]} : vector<16x128xf32> to vector<2x128xf32>
    %c7 = arith.constant 7 : index
    %c0_42 = arith.constant 0 : index
    %178 = vector.load %arg8[%c7, %c0_42] : memref<8x128xf32, #tpu.memory_space<vmem>>, vector<1x128xf32>
    %179 = vector.broadcast %178 : vector<1x128xf32> to vector<2x128xf32>
    %180 = arith.addf %177, %179 : vector<2x128xf32>
    %181 = arith.truncf %176 : vector<2x32xf32> to vector<2x32xbf16>
    %cst_43 = arith.constant dense<0.000000e+00> : vector<2x128xf32>
    %182 = tpu.matmul %181, %13, %cst_43 {dimension_numbers = #tpu.dot_dimension_numbers<[1], [0], [0], [1], [0, 0, 1, 1], [], []>} : vector<2x32xbf16>, vector<32x128xbf16>, vector<2x128xf32> -> vector<2x128xf32>
    %183 = arith.addf %180, %182 : vector<2x128xf32>
    %184 = vector.extract_strided_slice %183 {offsets = [0, 0], sizes = [2, 96], strides = [1, 1]} : vector<2x128xf32> to vector<2x96xf32>
    %185 = arith.negf %184 : vector<2x96xf32>
    %186 = math.exp %185 : vector<2x96xf32>
    %cst_44 = arith.constant 1.000000e+00 : f32
    %187 = vector.broadcast %cst_44 : f32 to vector<2x96xf32>
    %188 = arith.addf %187, %186 : vector<2x96xf32>
    %189 = arith.divf %187, %188 : vector<2x96xf32>
    %190 = vector.extract_strided_slice %183 {offsets = [0, 96], sizes = [2, 32], strides = [1, 1]} : vector<2x128xf32> to vector<2x32xf32>
    %191 = math.tanh %190 : vector<2x32xf32>
    %192 = vector.extract_strided_slice %189 {offsets = [0, 0], sizes = [2, 32], strides = [1, 1]} : vector<2x96xf32> to vector<2x32xf32>
    %193 = vector.extract_strided_slice %189 {offsets = [0, 32], sizes = [2, 32], strides = [1, 1]} : vector<2x96xf32> to vector<2x32xf32>
    %194 = vector.extract_strided_slice %189 {offsets = [0, 64], sizes = [2, 32], strides = [1, 1]} : vector<2x96xf32> to vector<2x32xf32>
    %195 = arith.mulf %193, %174 : vector<2x32xf32>
    %196 = arith.mulf %192, %191 : vector<2x32xf32>
    %197 = arith.addf %195, %196 : vector<2x32xf32>
    %198 = math.tanh %197 : vector<2x32xf32>
    %199 = arith.mulf %194, %198 : vector<2x32xf32>
    %c0_45 = arith.constant 0 : index
    %c0_46 = arith.constant 0 : index
    %200 = vector.load %arg11[%c0_45, %c0_46] : memref<1x33xf32, #tpu.memory_space<vmem>>, vector<1x32xf32>
    %c0_47 = arith.constant 0 : index
    %c32 = arith.constant 32 : index
    %201 = vector.load %arg11[%c0_47, %c32] : memref<1x33xf32, #tpu.memory_space<vmem>>, vector<1x1xf32>
    %202 = arith.truncf %199 : vector<2x32xf32> to vector<2x32xbf16>
    %c0_48 = arith.constant 0 : index
    %c0_49 = arith.constant 0 : index
    %203 = vector.load %arg9[%c0_48, %c0_49] : memref<32x32xbf16, #tpu.memory_space<vmem>>, vector<32x32xbf16>
    %cst_50 = arith.constant dense<0.000000e+00> : vector<2x32xf32>
    %204 = tpu.matmul %202, %203, %cst_50 {dimension_numbers = #tpu.dot_dimension_numbers<[1], [0], [0], [1], [0, 0, 1, 1], [], []>} : vector<2x32xbf16>, vector<32x32xbf16>, vector<2x32xf32> -> vector<2x32xf32>
    %205 = vector.broadcast %200 : vector<1x32xf32> to vector<2x32xf32>
    %206 = arith.addf %204, %205 : vector<2x32xf32>
    %cst_51 = arith.constant 0.000000e+00 : f32
    %207 = vector.broadcast %cst_51 : f32 to vector<2x32xf32>
    %208 = arith.maximumf %206, %207 : vector<2x32xf32>
    %209 = arith.truncf %208 : vector<2x32xf32> to vector<2x32xbf16>
    %c0_52 = arith.constant 0 : index
    %c0_53 = arith.constant 0 : index
    %210 = vector.load %arg10[%c0_52, %c0_53] : memref<32x1xbf16, #tpu.memory_space<vmem>>, vector<32x1xbf16>
    %cst_54 = arith.constant dense<0.000000e+00> : vector<2x1xf32>
    %211 = tpu.matmul %209, %210, %cst_54 {dimension_numbers = #tpu.dot_dimension_numbers<[1], [0], [0], [1], [0, 0, 1, 1], [], []>} : vector<2x32xbf16>, vector<32x1xbf16>, vector<2x1xf32> -> vector<2x1xf32>
    %212 = vector.broadcast %201 : vector<1x1xf32> to vector<2x1xf32>
    %213 = arith.addf %211, %212 : vector<2x1xf32>
    %c0_55 = arith.constant 0 : index
    %c0_56 = arith.constant 0 : index
    %214 = vector.load %arg12[%c0_55, %c0_56] : memref<2x1xf32, #tpu.memory_space<vmem>>, vector<2x1xf32>
    tpu.vector_store %arg12[%c0_55, %c0_56], %213 {strides = array<i32>} : memref<2x1xf32, #tpu.memory_space<vmem>>, vector<2x1xf32>,
    return
  }
}

</mosaic_0001>

<bundles_post_ra>
// kernel: mul.23
= control target key start
LH: loop header
LB: loop body
LE: loop exit
PB: predicated region body
PF: predicated region fallthrough
CT: control target
= control target key end

     0   :  { %s67_s10 = smov 14   ;;  %s68_s11 = smov 10   ;;  %vm3_vm0 = vcmask 15360   ;;  %vm9_vm1 = vcmask 130160   ;;  %vm15_vm2 = vcmask 113760   ;;  %vm21_vm3 = vcmask 97360   ;;  %s111_s0 = inlined_call_operand.vmem [shape: f32[8,2], index: 0, kind: input, shape index: {}]   ;;  %s112_s1 = inlined_call_operand.vmem [shape: f32[16], index: 1, kind: output, shape index: {}]  }
   0x1   :  { %v53_v0 = vld [vmem:[%s111_s0 + $0x7] sm:$0x1]   ;;  %v55_v1 = vld [vmem:[%s111_s0 + $0x5] sm:$0x1]   ;;  %v57_v2 = vld [vmem:[%s111_s0 + $0x3] sm:$0x1]  }
   0x2   :  { %7 = vrot.lane.b32.xlu0 %v53_v0, %s67_s10  ;;  %19 = vrot.lane.b32.xlu1 %v55_v1, %s68_s11  ;;  %s69_s14 = smov 6   ;;  %v54_v3 = vld [vmem:[%s111_s0 + $0x6] sm:$0x1]   ;;  %v56_v4 = vld [vmem:[%s111_s0 + $0x4] sm:$0x1]   ;;  %s70_s21 = smov 12  }
   0x3   :  { %31 = vrot.lane.b32.xlu2 %v57_v2, %s69_s14  ;;  %v58_v5 = vld [vmem:[%s111_s0 + $0x2] sm:$0x1]   ;;  %s71_s22 = smov 8   ;;  %s72_s23 = smov 4   ;;  %v59_v6 = vld [vmem:[%s111_s0 + $0x1] sm:$0x1]  }
   0x4   :  { %s73_s26 = smov 2   ;;  %v2_v7 = vld [vmem:[%s111_s0] sm:$0x1]   ;;  %vm27_vm4 = vcmask 80960   ;;  %vm33_vm5 = vcmask 64560   ;;  %vm39_vm6 = vcmask 48160  }
   0x5   :  { %4 = vst.msk [vmem:[#allocation0] sm:$0x1] %vm3_vm0, %v2_v7   ;;  %vm45_vm7 = vcmask 31760  }
   0xa   :  { %13 = vrot.lane.b32.xlu0 %v54_v3, %s70_s21  ;;  %25 = vrot.lane.b32.xlu1 %v56_v4, %s71_s22 }
   0xb   :  { %37 = vrot.lane.b32.xlu2 %v58_v5, %s72_s23 }
  0x12   :  { %43 = vrot.lane.b32.xlu0 %v59_v6, %s73_s26 }
  0x5d   :  { %v32_v8 = vpop.permute.xlu2 %31  }
  0x65   :  { %v38_v9 = vpop.permute.xlu2 %37  }
  0x74   :  { %v8_v10 = vpop.permute.xlu0 %7   ;;  %v20_v11 = vpop.permute.xlu1 %19  }
  0x75   :  { %10 = vst.msk [vmem:[#allocation0] sm:$0x1] %vm9_vm1, %v8_v10  }
  0x7c   :  { %v14_v12 = vpop.permute.xlu0 %13   ;;  %v26_v13 = vpop.permute.xlu1 %25  }
  0x7d   :  { %16 = vst.msk [vmem:[#allocation0] sm:$0x1] %vm15_vm2, %v14_v12  }
  0x7e   :  { %22 = vst.msk [vmem:[#allocation0] sm:$0x1] %vm21_vm3, %v20_v11  }
  0x7f   :  { %28 = vst.msk [vmem:[#allocation0] sm:$0x1] %vm27_vm4, %v26_v13  }
  0x80   :  { %34 = vst.msk [vmem:[#allocation0] sm:$0x1] %vm33_vm5, %v32_v8  }
  0x81   :  { %40 = vst.msk [vmem:[#allocation0] sm:$0x1] %vm39_vm6, %v38_v9  }
  0x84   :  { %v44_v14 = vpop.permute.xlu0 %43  }
  0x85   :  { %46 = vst.msk [vmem:[#allocation0] sm:$0x1] %vm45_vm7, %v44_v14  }
  0x8c   :  { %v49_v15 = vld [vmem:[#allocation0] sm:$0x1] }
  0x8d   :  { %52 = vst [vmem:[%s112_s1] sm:$0x1] %v49_v15 }

// kernel: amio_forward.1
= control target key start
LH: loop header
LB: loop body
LE: loop exit
PB: predicated region body
PF: predicated region fallthrough
CT: control target
= control target key end

     0   :  { %vm104_vm0 = vcmask 1043456   ;;  %vm94_vm1 = vcmask 64512   ;;  %vm57_vm2 = vcmask 130048   ;;  %v1003_v22 = vmov 0   ;;  %s1005_s22 = smov 64   ;;  %s1006_s20 = smov 96   ;;  %s1211_s5 = inlined_call_operand.vmem [shape: bf16[8,128], index: 5, kind: input, shape index: {}]   ;;  %s1212_s6 = inlined_call_operand.vmem [shape: bf16[8,128], index: 6, kind: input, shape index: {}]   ;;  %s1213_s1 = inlined_call_operand.vmem [shape: bf16[40,8], index: 1, kind: input, shape index: {}]   ;;  %s1214_s2 = inlined_call_operand.vmem [shape: bf16[32,8], index: 2, kind: input, shape index: {}]   ;;  %s1215_s4 = inlined_call_operand.vmem [shape: bf16[16,128], index: 4, kind: input, shape index: {}]   ;;  %s1216_s0 = inlined_call_operand.vmem [shape: bf16[16,16], index: 0, kind: input, shape index: {}]   ;;  %s1217_s7 = inlined_call_operand.vmem [shape: bf16[32,128], index: 7, kind: input, shape index: {}]   ;;  %s1218_s8 = inlined_call_operand.vmem [shape: f32[8,128], index: 8, kind: input, shape index: {}]   ;;  %s1219_s3 = inlined_call_operand.vmem [shape: bf16[16,88], index: 3, kind: input, shape index: {}]   ;;  %s1220_s9 = inlined_call_operand.vmem [shape: bf16[32,32], index: 9, kind: input, shape index: {}]   ;;  %s1221_s11 = inlined_call_operand.vmem [shape: f32[1,33], index: 11, kind: input, shape index: {}]   ;;  %s1222_s10 = inlined_call_operand.vmem [shape: bf16[32,1], index: 10, kind: input, shape index: {}]   ;;  %s1223_s12 = inlined_call_operand.vmem [shape: f32[2,1], index: 12, kind: output, shape index: {}]  }
   0x1   :  { %v80_v0 = vld [vmem:[%s1211_s5] sm:$0xf]  ;;  %v916_v8 = vld [vmem:[%s1213_s1 + $0x8] sm:$0xff]  ;;  %v79_v10 = vld [vmem:[%s1213_s1 + $0x10] sm:$0xf]  ;;  %vm187_vm3 = vcmask 719872  }
   0x2   :  { %v135_v1 = vld [vmem:[%s1212_s6] sm:$0xf]  ;;  %v106_v2 = vsel %vm104_vm0, %v80_v0, 0  ;;  %v918_v9 = vld [vmem:[%s1214_s2 + $0x8] sm:$0xff]  ;;  %v90_v11 = vunpack.c.l.b16 %v79_v10  ;;  %vm227_vm8 = vcmask 261120  }
   0x3   :  { %v153_v3 = vsel %vm104_vm0, %v135_v1, 0  ;;  %v915_v4 = vld [vmem:[%s1213_s1] sm:$0xff]  ;;  %115 = vmatpush.bf16.msra.mxu1 %v106_v2  ;;  %v921_v17 = vld [vmem:[%s1217_s7 + $0x8] sm:$0xff] }
   0x4   :  { %v917_v5 = vld [vmem:[%s1214_s2] sm:$0xff]  ;;  %162 = vmatpush.bf16.msra.mxu2 %v153_v3  ;;  %v93_v12 = vpack.c.b16 %v90_v11, %v90_v11 }
   0x5   :  { %v914_v6 = vld [vmem:[%s1215_s4] sm:$0xff] }
   0x6   :  { %68 = vmatpush.bf16.msra.mxu0 %v914_v6  ;;  %854 = vmatmul.msk.bf16.vlgmr.msra.gmra.mxu1 %vm94_vm1, %v915_v4  ;;  %v913_v7 = vld [vmem:[%s1216_s0] sm:$0xff] }
   0x7   :  { %865 = vmatmul.msk.bf16.vlgmr.msra.gmra.mxu2 %vm94_vm1, %v917_v5  ;;  %566 = vmatpush.bf16.msrb.mxu1 %v921_v17  ;;  %v920_v19 = vld [vmem:[%s1217_s7] sm:$0xff] }
   0x8   :  { %366 = vmatpush.bf16.msrb.mxu2 %v921_v17  ;;  %v919_v35 = vld [vmem:[%s1219_s3] sm:$0xff]  ;;  %s1004_s3 = smov 32  }
   0x9   :  { %845 = vmatmul.msk.bf16.vlgmr.msra.gmra.mxu0 %vm57_vm2, %v913_v7  ;;  %v930_v38 = vld [vmem:[%s1218_s8] ss:$0 sm:$0xff]  ;;  %v931_v2 = vld [vmem:[%s1218_s8 + $0x1] ss:$0 sm:$0xff] }
   0xa   :  { %237 = vmatpush.bf16.msrb.mxu0 %v921_v17 }
   0xb   :  { %567 = vmatpush.bf16.msrb.mxu1 %v920_v19 }
   0xc   :  { %367 = vmatpush.bf16.msrb.mxu2 %v920_v19 }
   0xe   :  { %238 = vmatpush.bf16.msrb.mxu0 %v920_v19 }
  0x10   :  { %634 = vmatpush.bf16.msra.mxu2 %v921_v17 }
  0x12   :  { %298 = vmatpush.bf16.msra.mxu0 %v921_v17 }
  0x14   :  { %635 = vmatpush.bf16.msra.mxu2 %v920_v19 }
  0x16   :  { %855 = vmatmul.msk.bf16.gmra.mxu1 %vm94_vm1, %v916_v8  ;;  %299 = vmatpush.bf16.msra.mxu0 %v920_v19 }
  0x17   :  { %866 = vmatmul.msk.bf16.gmra.mxu2 %vm94_vm1, %v918_v9 }
  0x19   :  { %239 = vmatmul.bf16.vlgmr.msrb.gmra.mxu0 %v1003_v22 }
  0x1a   :  { %502 = vmatpush.bf16.msrb.mxu0 %v921_v17 }
  0x1e   :  { %503 = vmatpush.bf16.msrb.mxu0 %v920_v19 }
  0x26   :  { %856 = vmatmul.msk.bf16.gmra.mxu1 %vm94_vm1, %v93_v12 }
  0x83   :  { %v117_v13 = vpop.f32.mrf.mxu1 }
  0x86   :  { %v70_v28 = vpop.f32.mrf.mxu0 }
  0x8a   :  { %v164_v14 = vpop.f32.mrf.mxu2 }
  0x8b   :  { %v119_v15 = vpop.f32.mrf.mxu1 }
  0x8c   :  { %v177_v32 = vpack.c.bf16 %v119_v15, %v117_v13 }
  0x8e   :  { %v72_v33 = vpop.f32.mrf.mxu0 }
  0x8f   :  { %v176_v34 = vpack.c.bf16 %v72_v33, %v70_v28 }
  0x92   :  { %v166_v16 = vpop.f32.mrf.mxu2 }
  0x93   :  { %v122_v18 = vpop.f32.mrf.mxu1 }
  0x96   :  { %v240_v36 = vpop.f32.mrf.mxu0 }
  0x9a   :  { %v169_v20 = vpop.f32.mrf.mxu2 }
  0x9b   :  { %v124_v21 = vpop.f32.mrf.mxu1  ;;  %v180_v27 = vpack.c.bf16 %v169_v20, %v166_v16 }
  0x9c   :  { %v178_v31 = vpack.c.bf16 %v124_v21, %v122_v18 }
  0x9e   :  { %v242_v37 = vpop.f32.mrf.mxu0 }
  0xa2   :  { %v171_v23 = vpop.f32.mrf.mxu2 }
  0xa3   :  { %v181_v24 = vpack.c.bf16 %v171_v23, %v171_v23  ;;  %v127_v25 = vpop.f32.mrf.mxu1 }
  0xa4   :  { %v179_v29 = vpack.c.bf16 %v164_v14, %v127_v25 }
  0xa5   :  { %v192_v26 = vsel %vm104_vm0, %v181_v24, 0 }
  0xa6   :  { %196 = vmatpush.bf16.msra.mxu3 %v192_v26 }
  0xaa   :  { %197 = vmatpush.bf16.msra.mxu3 %v180_v27 }
  0xab   :  { %v129_v30 = vpop.f32.mrf.mxu1 }
  0xae   :  { %198 = vmatpush.bf16.msra.mxu3 %v179_v29 }
  0xb2   :  { %199 = vmatpush.bf16.msra.mxu3 %v178_v31 }
  0xb6   :  { %200 = vmatpush.bf16.msra.mxu3 %v177_v32 }
  0xba   :  { %201 = vmatpush.bf16.msra.mxu3 %v176_v34  ;;  %v932_v34 = vld [vmem:[%s1218_s8 + $0x2] ss:$0 sm:$0xff] }
  0xbd   :  { %871 = vmatmul.msk.bf16.vlgmr.msra.gmra.mxu3 %vm187_vm3, %v919_v35 }
  0xbe   :  { %434 = vmatpush.bf16.msrb.mxu3 %v921_v17 }
  0xc2   :  { %435 = vmatpush.bf16.msrb.mxu3 %v920_v19 }
  0xc6   :  { %702 = vmatpush.bf16.msra.mxu3 %v921_v17 }
  0xca   :  { %703 = vmatpush.bf16.msra.mxu3 %v920_v19 }
 0x140   :  { %v1119_v39 = vpop.f32.mrf.mxu3 }
 0x141   :  { %v214_v40 = vadd.f32 %v930_v38, %v1119_v39  ;;  %v284_v4 = vadd.f32 %v931_v2, %v1119_v39 }
 0x143   :  { %v244_v41 = vadd.f32 %v240_v36, %v214_v40  ;;  %v351_v36 = vadd.f32 %v932_v34, %v1119_v39 }
 0x145   :  { %939 = vtanh.f32 %v244_v41  ;;  %v880_v43 = vmul.f32 -1.442695, %v244_v41 }
 0x147   :  { %941 = vpow2.f32 %v880_v43 }
 0x14b   :  { %v940_v42 = vpop.eup %939 }
 0x14c   :  { %267 = vrot.lane.b32.xlu0 %v940_v42, %s1004_s3 }
 0x14d   :  { %v942_v44 = vpop.eup %941 }
 0x14e   :  { %v248_v45 = vadd.f32 1.0, %v942_v44 }
 0x150   :  { %943 = vrcp.f32 %v248_v45  ;;  %v260_v51 = vand.u32 2147483648, %v248_v45  ;;  %vm254_vm5 = vweird.f32 %v248_v45  ;;  %v258_v52 = vand.u32 2147483647, %v248_v45 }
 0x152   :  { %v261_v54 = vor.u32 1.1754944e-38, %v260_v51  ;;  %vm259_vm7 = vcmp.eq.f32.partialorder %v258_v52, 8.507059e+37 }
 0x156   :  { %v944_v46 = vpop.eup %943 }
 0x157   :  { %v250_v47 = vmul.f32 %v944_v46, %v248_v45  ;;  %vm255_vm4 = vweird.f32 %v944_v46 }
 0x158   :  { %vm256_vm6 = vmor %vm254_vm5, %vm255_vm4 }
 0x159   :  { %v251_v48 = vsub.f32 1.0, %v250_v47 }
 0x15b   :  { %v252_v49 = vmul.f32 %v944_v46, %v251_v48 }
 0x15d   :  { %v253_v50 = vadd.f32 %v944_v46, %v252_v49 }
 0x15f   :  { %v257_v53 = vsel %vm256_vm6, %v944_v46, %v253_v50 }
 0x160   :  { %v262_v56 = vsel %vm259_vm7, %v261_v54, %v257_v53 }
 0x161   :  { %v265_v58 = vmul.f32 0.0, %v262_v56 }
 0x1be   :  { %v268_v55 = vpop.permute.xlu0 %267 }
 0x1bf   :  { %v270_v57 = vmul.f32 %v268_v55, %v262_v56 }
 0x1c1   :  { %272 = vrot.lane.b32.xlu0 %v270_v57, %s1004_s3 }
 0x233   :  { %v273_v59 = vpop.permute.xlu0 %272 }
 0x234   :  { %v275_v60 = vadd.f32 %v273_v59, %v265_v58 }
 0x236   :  { %945 = vtanh.f32 %v275_v60  ;;  %v330_v24 = vrot.slane %v275_v60, 6 }
 0x23c   :  { %v946_v61 = vpop.eup %945 }
 0x23d   :  { %278 = vrot.lane.b32.xlu1 %v946_v61, %s1004_s3 }
 0x2af   :  { %v279_v62 = vpop.permute.xlu1 %278 }
 0x2b0   :  { %v281_v63 = vmul.f32 %v279_v62, %v262_v56 }
 0x2b2   :  { %v285_v0 = vpack.c.bf16 %v281_v63, %v281_v63 }
 0x2b4   :  { %287 = vrot.lane.b32.xlu1 %v285_v0, %s1005_s22 }
 0x326   :  { %v288_v1 = vpop.permute.xlu1 %287 }
 0x327   :  { %881 = vmatmul.msk.bf16.vlgmr.msra.gmra.mxu0 %vm227_vm8, %v288_v1 }
 0x3a4   :  { %v301_v3 = vpop.f32.mrf.mxu0 }
 0x3a5   :  { %v306_v5 = vrot.slane %v301_v3, 6  ;;  %v1145_v3 = vpop.f32.mrf.mxu3 }
 0x3a7   :  { %v308_v6 = vadd.f32 %v306_v5, %v284_v4  ;;  %v933_v4 = vld [vmem:[%s1218_s8 + $0x3] ss:$0 sm:$0xff] }
 0x3a9   :  { %947 = vtanh.f32 %v308_v6  ;;  %v882_v9 = vmul.f32 -1.442695, %v308_v6  ;;  %v419_v6 = vadd.f32 %v933_v4, %v1119_v39 }
 0x3ab   :  { %949 = vpow2.f32 %v882_v9 }
 0x3ac   :  { %v303_v7 = vpop.f32.mrf.mxu0 }
 0x3af   :  { %v948_v8 = vpop.eup %947 }
 0x3b0   :  { %334 = vrot.lane.b32.xlu2 %v948_v8, %s1004_s3 }
 0x3b1   :  { %v950_v10 = vpop.eup %949 }
 0x3b2   :  { %v312_v11 = vadd.f32 1.0, %v950_v10 }
 0x3b4   :  { %951 = vrcp.f32 %v312_v11  ;;  %v324_v17 = vand.u32 2147483648, %v312_v11  ;;  %vm318_vm10 = vweird.f32 %v312_v11  ;;  %v322_v18 = vand.u32 2147483647, %v312_v11 }
 0x3b6   :  { %v325_v20 = vor.u32 1.1754944e-38, %v324_v17  ;;  %vm323_vm12 = vcmp.eq.f32.partialorder %v322_v18, 8.507059e+37 }
 0x3ba   :  { %v952_v12 = vpop.eup %951 }
 0x3bb   :  { %v314_v13 = vmul.f32 %v952_v12, %v312_v11  ;;  %vm319_vm9 = vweird.f32 %v952_v12 }
 0x3bc   :  { %vm320_vm11 = vmor %vm318_vm10, %vm319_vm9 }
 0x3bd   :  { %v315_v14 = vsub.f32 1.0, %v314_v13 }
 0x3bf   :  { %v316_v15 = vmul.f32 %v952_v12, %v315_v14 }
 0x3c1   :  { %v317_v16 = vadd.f32 %v952_v12, %v316_v15 }
 0x3c3   :  { %v321_v19 = vsel %vm320_vm11, %v952_v12, %v317_v16 }
 0x3c4   :  { %v326_v22 = vsel %vm323_vm12, %v325_v20, %v321_v19 }
 0x3c5   :  { %v332_v25 = vmul.f32 %v330_v24, %v326_v22 }
 0x40a   :  { %v335_v21 = vpop.permute.xlu2 %334 }
 0x40b   :  { %v337_v23 = vmul.f32 %v335_v21, %v326_v22 }
 0x40d   :  { %339 = vrot.lane.b32.xlu2 %v337_v23, %s1004_s3 }
 0x467   :  { %v340_v26 = vpop.permute.xlu2 %339 }
 0x468   :  { %v342_v27 = vadd.f32 %v340_v26, %v332_v25 }
 0x46a   :  { %953 = vtanh.f32 %v342_v27  ;;  %v398_v57 = vrot.slane %v342_v27, 6 }
 0x470   :  { %v954_v28 = vpop.eup %953 }
 0x471   :  { %345 = vrot.lane.b32.xlu0 %v954_v28, %s1004_s3 }
 0x4e3   :  { %v346_v29 = vpop.permute.xlu0 %345 }
 0x4e4   :  { %v348_v30 = vmul.f32 %v346_v29, %v326_v22 }
 0x4e6   :  { %v352_v31 = vpack.c.bf16 %v348_v30, %v348_v30 }
 0x4e8   :  { %v354_v32 = vrot.slane %v352_v31, 1 }
 0x4ea   :  { %355 = vrot.lane.b32.xlu1 %v354_v32, %s1005_s22 }
 0x55c   :  { %v356_v33 = vpop.permute.xlu1 %355 }
 0x55d   :  { %883 = vmatmul.msk.bf16.vlgmr.msrb.gmra.mxu2 %vm227_vm8, %v356_v33 }
 0x5e0   :  { %v369_v35 = vpop.f32.mrf.mxu2 }
 0x5e1   :  { %v374_v37 = vrot.slane %v369_v35, 4  ;;  %v934_v35 = vld [vmem:[%s1218_s8 + $0x4] ss:$0 sm:$0xff] }
 0x5e3   :  { %v376_v38 = vadd.f32 %v374_v37, %v351_v36  ;;  %v487_v36 = vadd.f32 %v934_v35, %v1145_v3 }
 0x5e5   :  { %955 = vtanh.f32 %v376_v38  ;;  %v884_v42 = vmul.f32 -1.442695, %v376_v38 }
 0x5e7   :  { %957 = vpow2.f32 %v884_v42 }
 0x5e8   :  { %v371_v40 = vpop.f32.mrf.mxu2 }
 0x5eb   :  { %v956_v41 = vpop.eup %955 }
 0x5ec   :  { %402 = vrot.lane.b32.xlu2 %v956_v41, %s1004_s3 }
 0x5ed   :  { %v958_v43 = vpop.eup %957 }
 0x5ee   :  { %v380_v44 = vadd.f32 1.0, %v958_v43 }
 0x5f0   :  { %959 = vrcp.f32 %v380_v44  ;;  %v392_v50 = vand.u32 2147483648, %v380_v44  ;;  %vm386_vm14 = vweird.f32 %v380_v44  ;;  %v390_v51 = vand.u32 2147483647, %v380_v44 }
 0x5f2   :  { %v393_v53 = vor.u32 1.1754944e-38, %v392_v50  ;;  %vm391_vm0 = vcmp.eq.f32.partialorder %v390_v51, 8.507059e+37 }
 0x5f6   :  { %v960_v45 = vpop.eup %959 }
 0x5f7   :  { %v382_v46 = vmul.f32 %v960_v45, %v380_v44  ;;  %vm387_vm13 = vweird.f32 %v960_v45 }
 0x5f8   :  { %vm388_vm15 = vmor %vm386_vm14, %vm387_vm13 }
 0x5f9   :  { %v383_v47 = vsub.f32 1.0, %v382_v46 }
 0x5fb   :  { %v384_v48 = vmul.f32 %v960_v45, %v383_v47 }
 0x5fd   :  { %v385_v49 = vadd.f32 %v960_v45, %v384_v48 }
 0x5ff   :  { %v389_v52 = vsel %vm388_vm15, %v960_v45, %v385_v49 }
 0x600   :  { %v394_v55 = vsel %vm391_vm0, %v393_v53, %v389_v52 }
 0x601   :  { %v400_v58 = vmul.f32 %v398_v57, %v394_v55 }
 0x646   :  { %v403_v54 = vpop.permute.xlu2 %402 }
 0x647   :  { %v405_v56 = vmul.f32 %v403_v54, %v394_v55 }
 0x649   :  { %407 = vrot.lane.b32.xlu0 %v405_v56, %s1004_s3 }
 0x6bb   :  { %v408_v59 = vpop.permute.xlu0 %407 }
 0x6bc   :  { %v410_v60 = vadd.f32 %v408_v59, %v400_v58 }
 0x6be   :  { %961 = vtanh.f32 %v410_v60  ;;  %v466_v25 = vrot.slane %v410_v60, 6 }
 0x6c4   :  { %v962_v61 = vpop.eup %961 }
 0x6c5   :  { %413 = vrot.lane.b32.xlu1 %v962_v61, %s1004_s3 }
 0x737   :  { %v414_v62 = vpop.permute.xlu1 %413 }
 0x738   :  { %v416_v63 = vmul.f32 %v414_v62, %v394_v55 }
 0x73a   :  { %v420_v0 = vpack.c.bf16 %v416_v63, %v416_v63 }
 0x73c   :  { %v422_v1 = vrot.slane %v420_v0, 2 }
 0x73e   :  { %423 = vrot.lane.b32.xlu2 %v422_v1, %s1005_s22 }
 0x798   :  { %v424_v2 = vpop.permute.xlu2 %423 }
 0x799   :  { %885 = vmatmul.msk.bf16.vlgmr.msrb.gmra.mxu3 %vm227_vm8, %v424_v2  ;;  %v935_v2 = vld [vmem:[%s1218_s8 + $0x5] ss:$0 sm:$0xff] }
 0x81c   :  { %v437_v5 = vpop.f32.mrf.mxu3 }
 0x81d   :  { %v442_v7 = vrot.slane %v437_v5, 2  ;;  %v552_v5 = vadd.f32 %v935_v2, %v1145_v3 }
 0x81f   :  { %v444_v8 = vadd.f32 %v442_v7, %v419_v6 }
 0x821   :  { %963 = vtanh.f32 %v444_v8  ;;  %v886_v11 = vmul.f32 -1.442695, %v444_v8 }
 0x823   :  { %965 = vpow2.f32 %v886_v11 }
 0x824   :  { %v439_v9 = vpop.f32.mrf.mxu3 }
 0x827   :  { %v964_v10 = vpop.eup %963 }
 0x828   :  { %470 = vrot.lane.b32.xlu0 %v964_v10, %s1004_s3 }
 0x829   :  { %v966_v12 = vpop.eup %965 }
 0x82a   :  { %v448_v13 = vadd.f32 1.0, %v966_v12 }
 0x82c   :  { %967 = vrcp.f32 %v448_v13  ;;  %v460_v19 = vand.u32 2147483648, %v448_v13  ;;  %vm454_vm2 = vweird.f32 %v448_v13  ;;  %v458_v39 = vand.u32 2147483647, %v448_v13 }
 0x82e   :  { %v461_v21 = vor.u32 1.1754944e-38, %v460_v19  ;;  %vm459_vm4 = vcmp.eq.f32.partialorder %v458_v39, 8.507059e+37 }
 0x832   :  { %v968_v14 = vpop.eup %967 }
 0x833   :  { %v450_v15 = vmul.f32 %v968_v14, %v448_v13  ;;  %vm455_vm1 = vweird.f32 %v968_v14 }
 0x834   :  { %vm456_vm3 = vmor %vm454_vm2, %vm455_vm1 }
 0x835   :  { %v451_v16 = vsub.f32 1.0, %v450_v15 }
 0x837   :  { %v452_v17 = vmul.f32 %v968_v14, %v451_v16 }
 0x839   :  { %v453_v18 = vadd.f32 %v968_v14, %v452_v17 }
 0x83b   :  { %v457_v20 = vsel %vm456_vm3, %v968_v14, %v453_v18 }
 0x83c   :  { %v462_v23 = vsel %vm459_vm4, %v461_v21, %v457_v20 }
 0x83d   :  { %v468_v26 = vmul.f32 %v466_v25, %v462_v23 }
 0x89a   :  { %v471_v22 = vpop.permute.xlu0 %470 }
 0x89b   :  { %v473_v24 = vmul.f32 %v471_v22, %v462_v23 }
 0x89d   :  { %475 = vrot.lane.b32.xlu1 %v473_v24, %s1004_s3 }
 0x90f   :  { %v476_v27 = vpop.permute.xlu1 %475 }
 0x910   :  { %v478_v28 = vadd.f32 %v476_v27, %v468_v26 }
 0x912   :  { %969 = vtanh.f32 %v478_v28  ;;  %v531_v57 = vrot.slane %v478_v28, 6 }
 0x918   :  { %v970_v29 = vpop.eup %969 }
 0x919   :  { %481 = vrot.lane.b32.xlu2 %v970_v29, %s1004_s3 }
 0x973   :  { %v482_v30 = vpop.permute.xlu2 %481 }
 0x974   :  { %v484_v31 = vmul.f32 %v482_v30, %v462_v23 }
 0x976   :  { %v488_v32 = vpack.c.bf16 %v484_v31, %v484_v31 }
 0x978   :  { %v490_v33 = vrot.slane %v488_v32, 3 }
 0x97a   :  { %491 = vrot.lane.b32.xlu0 %v490_v33, %s1005_s22 }
 0x9ec   :  { %v492_v34 = vpop.permute.xlu0 %491 }
 0x9ed   :  { %887 = vmatmul.msk.bf16.vlgmr.msrb.gmra.mxu0 %vm227_vm8, %v492_v34  ;;  %v936_v34 = vld [vmem:[%s1218_s8 + $0x6] ss:$0 sm:$0xff] }
 0xa6a   :  { %v505_v37 = vpop.f32.mrf.mxu0 }
 0xa6b   :  { %v509_v38 = vadd.f32 %v505_v37, %v487_v36  ;;  %v619_v36 = vadd.f32 %v936_v34, %v1145_v3 }
 0xa6d   :  { %971 = vtanh.f32 %v509_v38  ;;  %v888_v42 = vmul.f32 -1.442695, %v509_v38 }
 0xa6f   :  { %973 = vpow2.f32 %v888_v42 }
 0xa72   :  { %v507_v40 = vpop.f32.mrf.mxu0 }
 0xa73   :  { %v972_v41 = vpop.eup %971 }
 0xa74   :  { %535 = vrot.lane.b32.xlu1 %v972_v41, %s1004_s3 }
 0xa75   :  { %v974_v43 = vpop.eup %973 }
 0xa76   :  { %v513_v44 = vadd.f32 1.0, %v974_v43 }
 0xa78   :  { %975 = vrcp.f32 %v513_v44  ;;  %v525_v50 = vand.u32 2147483648, %v513_v44  ;;  %vm519_vm6 = vweird.f32 %v513_v44  ;;  %v523_v51 = vand.u32 2147483647, %v513_v44 }
 0xa7a   :  { %v526_v53 = vor.u32 1.1754944e-38, %v525_v50  ;;  %vm524_vm9 = vcmp.eq.f32.partialorder %v523_v51, 8.507059e+37 }
 0xa7e   :  { %v976_v45 = vpop.eup %975 }
 0xa7f   :  { %v515_v46 = vmul.f32 %v976_v45, %v513_v44  ;;  %vm520_vm5 = vweird.f32 %v976_v45 }
 0xa80   :  { %vm521_vm7 = vmor %vm519_vm6, %vm520_vm5  ;;  %vm831_vm6 = vcmask 1024  }
 0xa81   :  { %v516_v47 = vsub.f32 1.0, %v515_v46 }
 0xa83   :  { %v517_v48 = vmul.f32 %v976_v45, %v516_v47 }
 0xa85   :  { %v518_v49 = vadd.f32 %v976_v45, %v517_v48 }
 0xa87   :  { %v522_v52 = vsel %vm521_vm7, %v976_v45, %v518_v49 }
 0xa88   :  { %v527_v55 = vsel %vm524_vm9, %v526_v53, %v522_v52 }
 0xa89   :  { %v533_v58 = vmul.f32 %v531_v57, %v527_v55 }
 0xae6   :  { %v536_v54 = vpop.permute.xlu1 %535 }
 0xae7   :  { %v538_v56 = vmul.f32 %v536_v54, %v527_v55 }
 0xae9   :  { %540 = vrot.lane.b32.xlu2 %v538_v56, %s1004_s3 }
 0xb43   :  { %v541_v59 = vpop.permute.xlu2 %540 }
 0xb44   :  { %v543_v60 = vadd.f32 %v541_v59, %v533_v58 }
 0xb46   :  { %977 = vtanh.f32 %v543_v60  ;;  %v598_v24 = vrot.slane %v543_v60, 6 }
 0xb4c   :  { %v978_v61 = vpop.eup %977 }
 0xb4d   :  { %546 = vrot.lane.b32.xlu0 %v978_v61, %s1004_s3 }
 0xbbf   :  { %v547_v62 = vpop.permute.xlu0 %546 }
 0xbc0   :  { %v549_v63 = vmul.f32 %v547_v62, %v527_v55 }
 0xbc2   :  { %v553_v0 = vpack.c.bf16 %v549_v63, %v549_v63 }
 0xbc4   :  { %555 = vrot.lane.b32.xlu1 %v553_v0, %s1005_s22 }
 0xc36   :  { %v556_v1 = vpop.permute.xlu1 %555 }
 0xc37   :  { %889 = vmatmul.msk.bf16.vlgmr.msrb.gmra.mxu1 %vm227_vm8, %v556_v1 }
 0xcb4   :  { %v569_v4 = vpop.f32.mrf.mxu1 }
 0xcb5   :  { %v574_v6 = vrot.slane %v569_v4, 6  ;;  %v937_v4 = vld [vmem:[%s1218_s8 + $0x7] ss:$0 sm:$0xff] }
 0xcb7   :  { %v576_v7 = vadd.f32 %v574_v6, %v552_v5  ;;  %v687_v6 = vadd.f32 %v937_v4, %v1145_v3 }
 0xcb9   :  { %979 = vtanh.f32 %v576_v7  ;;  %v890_v10 = vmul.f32 -1.442695, %v576_v7 }
 0xcbb   :  { %981 = vpow2.f32 %v890_v10 }
 0xcbc   :  { %v571_v8 = vpop.f32.mrf.mxu1 }
 0xcbf   :  { %v980_v9 = vpop.eup %979 }
 0xcc0   :  { %602 = vrot.lane.b32.xlu2 %v980_v9, %s1004_s3 }
 0xcc1   :  { %v982_v11 = vpop.eup %981 }
 0xcc2   :  { %v580_v12 = vadd.f32 1.0, %v982_v11 }
 0xcc4   :  { %983 = vrcp.f32 %v580_v12  ;;  %v592_v18 = vand.u32 2147483648, %v580_v12  ;;  %vm586_vm11 = vweird.f32 %v580_v12  ;;  %v590_v19 = vand.u32 2147483647, %v580_v12 }
 0xcc6   :  { %v593_v20 = vor.u32 1.1754944e-38, %v592_v18  ;;  %vm591_vm13 = vcmp.eq.f32.partialorder %v590_v19, 8.507059e+37 }
 0xcca   :  { %v984_v13 = vpop.eup %983 }
 0xccb   :  { %v582_v14 = vmul.f32 %v984_v13, %v580_v12  ;;  %vm587_vm10 = vweird.f32 %v984_v13 }
 0xccc   :  { %vm588_vm12 = vmor %vm586_vm11, %vm587_vm10 }
 0xccd   :  { %v583_v15 = vsub.f32 1.0, %v582_v14 }
 0xccf   :  { %v584_v16 = vmul.f32 %v984_v13, %v583_v15 }
 0xcd1   :  { %v585_v17 = vadd.f32 %v984_v13, %v584_v16 }
 0xcd3   :  { %v589_v39 = vsel %vm588_vm12, %v984_v13, %v585_v17 }
 0xcd4   :  { %v594_v22 = vsel %vm591_vm13, %v593_v20, %v589_v39 }
 0xcd5   :  { %v600_v25 = vmul.f32 %v598_v24, %v594_v22 }
 0xd1a   :  { %v603_v21 = vpop.permute.xlu2 %602 }
 0xd1b   :  { %v605_v23 = vmul.f32 %v603_v21, %v594_v22 }
 0xd1d   :  { %607 = vrot.lane.b32.xlu0 %v605_v23, %s1004_s3 }
 0xd8f   :  { %v608_v26 = vpop.permute.xlu0 %607 }
 0xd90   :  { %v610_v27 = vadd.f32 %v608_v26, %v600_v25 }
 0xd92   :  { %985 = vtanh.f32 %v610_v27  ;;  %v666_v57 = vrot.slane %v610_v27, 6 }
 0xd98   :  { %v986_v28 = vpop.eup %985 }
 0xd99   :  { %613 = vrot.lane.b32.xlu1 %v986_v28, %s1004_s3 }
 0xe0b   :  { %v614_v29 = vpop.permute.xlu1 %613 }
 0xe0c   :  { %v616_v30 = vmul.f32 %v614_v29, %v594_v22  ;;  %v923_v29 = vld [vmem:[%s1220_s9 + $0x8] sm:$0xff] }
 0xe0d   :  { %787 = vmatpush.bf16.msra.mxu0 %v923_v29 }
 0xe0e   :  { %v620_v31 = vpack.c.bf16 %v616_v30, %v616_v30  ;;  %v922_v30 = vld [vmem:[%s1220_s9] sm:$0xff] }
 0xe10   :  { %v622_v32 = vrot.slane %v620_v31, 1 }
 0xe11   :  { %788 = vmatpush.bf16.msra.mxu0 %v922_v30 }
 0xe12   :  { %623 = vrot.lane.b32.xlu2 %v622_v32, %s1005_s22 }
 0xe6c   :  { %v624_v33 = vpop.permute.xlu2 %623 }
 0xe6d   :  { %891 = vmatmul.msk.bf16.vlgmr.msra.gmra.mxu2 %vm227_vm8, %v624_v33 }
 0xef0   :  { %v637_v35 = vpop.f32.mrf.mxu2 }
 0xef1   :  { %v642_v37 = vrot.slane %v637_v35, 4  ;;  %v925_v35 = vld [vmem:[%s1222_s10 + $0x8] sm:$0xff] }
 0xef2   :  { %824 = vmatpush.bf16.msra.mxu1 %v925_v35 }
 0xef3   :  { %v644_v38 = vadd.f32 %v642_v37, %v619_v36  ;;  %v924_v36 = vld [vmem:[%s1222_s10] sm:$0xff] }
 0xef5   :  { %987 = vtanh.f32 %v644_v38  ;;  %v892_v42 = vmul.f32 -1.442695, %v644_v38  ;;  %v938_v38 = vld [vmem:[%s1221_s11] ss:$0 sm:$0xff] }
 0xef6   :  { %825 = vmatpush.bf16.msra.mxu1 %v924_v36 }
 0xef7   :  { %989 = vpow2.f32 %v892_v42 }
 0xef8   :  { %v639_v40 = vpop.f32.mrf.mxu2 }
 0xefb   :  { %v988_v41 = vpop.eup %987 }
 0xefc   :  { %670 = vrot.lane.b32.xlu0 %v988_v41, %s1004_s3 }
 0xefd   :  { %v990_v43 = vpop.eup %989 }
 0xefe   :  { %v648_v44 = vadd.f32 1.0, %v990_v43 }
 0xf00   :  { %991 = vrcp.f32 %v648_v44  ;;  %v660_v50 = vand.u32 2147483648, %v648_v44  ;;  %vm654_vm15 = vweird.f32 %v648_v44  ;;  %v658_v51 = vand.u32 2147483647, %v648_v44 }
 0xf02   :  { %v661_v53 = vor.u32 1.1754944e-38, %v660_v50  ;;  %vm659_vm1 = vcmp.eq.f32.partialorder %v658_v51, 8.507059e+37 }
 0xf06   :  { %v992_v45 = vpop.eup %991 }
 0xf07   :  { %v650_v46 = vmul.f32 %v992_v45, %v648_v44  ;;  %vm655_vm14 = vweird.f32 %v992_v45 }
 0xf08   :  { %vm656_vm0 = vmor %vm654_vm15, %vm655_vm14 }
 0xf09   :  { %v651_v47 = vsub.f32 1.0, %v650_v46 }
 0xf0b   :  { %v652_v48 = vmul.f32 %v992_v45, %v651_v47 }
 0xf0d   :  { %v653_v49 = vadd.f32 %v992_v45, %v652_v48 }
 0xf0f   :  { %v657_v52 = vsel %vm656_vm0, %v992_v45, %v653_v49 }
 0xf10   :  { %v662_v55 = vsel %vm659_vm1, %v661_v53, %v657_v52 }
 0xf11   :  { %v668_v58 = vmul.f32 %v666_v57, %v662_v55 }
 0xf6e   :  { %v671_v54 = vpop.permute.xlu0 %670 }
 0xf6f   :  { %v673_v56 = vmul.f32 %v671_v54, %v662_v55 }
 0xf71   :  { %675 = vrot.lane.b32.xlu1 %v673_v56, %s1004_s3 }
 0xfe3   :  { %v676_v59 = vpop.permute.xlu1 %675 }
 0xfe4   :  { %v678_v60 = vadd.f32 %v676_v59, %v668_v58 }
 0xfe6   :  { %993 = vtanh.f32 %v678_v60  ;;  %v734_v24 = vrot.slane %v678_v60, 6 }
 0xfec   :  { %v994_v61 = vpop.eup %993 }
 0xfed   :  { %681 = vrot.lane.b32.xlu2 %v994_v61, %s1004_s3 }
0x1047   :  { %v682_v62 = vpop.permute.xlu2 %681 }
0x1048   :  { %v684_v63 = vmul.f32 %v682_v62, %v662_v55 }
0x104a   :  { %v688_v0 = vpack.c.bf16 %v684_v63, %v684_v63 }
0x104c   :  { %v690_v1 = vrot.slane %v688_v0, 2 }
0x104e   :  { %691 = vrot.lane.b32.xlu0 %v690_v1, %s1005_s22 }
0x10c0   :  { %v692_v2 = vpop.permute.xlu0 %691 }
0x10c1   :  { %893 = vmatmul.msk.bf16.vlgmr.msra.gmra.mxu3 %vm227_vm8, %v692_v2 }
0x1144   :  { %v705_v5 = vpop.f32.mrf.mxu3 }
0x1145   :  { %v710_v7 = vrot.slane %v705_v5, 2 }
0x1147   :  { %v712_v8 = vadd.f32 %v710_v7, %v687_v6 }
0x1149   :  { %995 = vtanh.f32 %v712_v8  ;;  %v894_v11 = vmul.f32 -1.442695, %v712_v8 }
0x114b   :  { %997 = vpow2.f32 %v894_v11 }
0x114c   :  { %v707_v9 = vpop.f32.mrf.mxu3 }
0x114f   :  { %v996_v10 = vpop.eup %995 }
0x1150   :  { %738 = vrot.lane.b32.xlu1 %v996_v10, %s1004_s3 }
0x1151   :  { %v998_v12 = vpop.eup %997 }
0x1152   :  { %v716_v13 = vadd.f32 1.0, %v998_v12 }
0x1154   :  { %999 = vrcp.f32 %v716_v13  ;;  %v728_v19 = vand.u32 2147483648, %v716_v13  ;;  %vm722_vm3 = vweird.f32 %v716_v13  ;;  %v726_v3 = vand.u32 2147483647, %v716_v13 }
0x1156   :  { %v729_v20 = vor.u32 1.1754944e-38, %v728_v19  ;;  %vm727_vm5 = vcmp.eq.f32.partialorder %v726_v3, 8.507059e+37 }
0x115a   :  { %v1000_v14 = vpop.eup %999 }
0x115b   :  { %v718_v15 = vmul.f32 %v1000_v14, %v716_v13  ;;  %vm723_vm2 = vweird.f32 %v1000_v14 }
0x115c   :  { %vm724_vm4 = vmor %vm722_vm3, %vm723_vm2 }
0x115d   :  { %v719_v16 = vsub.f32 1.0, %v718_v15 }
0x115f   :  { %v720_v17 = vmul.f32 %v1000_v14, %v719_v16 }
0x1161   :  { %v721_v18 = vadd.f32 %v1000_v14, %v720_v17 }
0x1163   :  { %v725_v39 = vsel %vm724_vm4, %v1000_v14, %v721_v18 }
0x1164   :  { %v730_v22 = vsel %vm727_vm5, %v729_v20, %v725_v39 }
0x1165   :  { %v736_v25 = vmul.f32 %v734_v24, %v730_v22 }
0x11c2   :  { %v739_v21 = vpop.permute.xlu1 %738 }
0x11c3   :  { %v741_v23 = vmul.f32 %v739_v21, %v730_v22 }
0x11c5   :  { %743 = vrot.lane.b32.xlu2 %v741_v23, %s1004_s3 }
0x11cd   :  { %812 = vrot.lane.b32.xlu2 %v938_v38, %s1006_s20 }
0x121f   :  { %v744_v26 = vpop.permute.xlu2 %743 }
0x1220   :  { %v746_v27 = vadd.f32 %v744_v26, %v736_v25 }
0x1222   :  { %1001 = vtanh.f32 %v746_v27 }
0x1227   :  { %v813_v45 = vpop.permute.xlu2 %812 }
0x1228   :  { %v1002_v28 = vpop.eup %1001 }
0x1229   :  { %749 = vrot.lane.b32.xlu0 %v1002_v28, %s1004_s3 }
0x129b   :  { %v750_v31 = vpop.permute.xlu0 %749 }
0x129c   :  { %v752_v32 = vmul.f32 %v750_v31, %v730_v22 }
0x129e   :  { %v754_v33 = vpack.c.bf16 %v752_v32, %v752_v32 }
0x12a0   :  { %v763_v34 = vrot.slane %v754_v33, 3 }
0x12a2   :  { %764 = vrot.lane.b32.xlu1 %v763_v34, %s1005_s22 }
0x1314   :  { %v765_v37 = vpop.permute.xlu1 %764 }
0x1315   :  { %903 = vmatmul.msk.bf16.vlgmr.msra.gmra.mxu0 %vm227_vm8, %v765_v37 }
0x1392   :  { %v790_v40 = vpop.f32.mrf.mxu0 }
0x1393   :  { %v791_v41 = vadd.f32 %v938_v38, %v790_v40 }
0x1395   :  { %v794_v42 = vmax.f32 %v791_v41, 0.0 }
0x1397   :  { %v795_v43 = vpack.c.bf16 %v794_v42, %v794_v42 }
0x1399   :  { %912 = vmatmul.msk.bf16.vlgmr.msra.gmra.mxu1 %vm227_vm8, %v795_v43 }
0x139a   :  { %v792_v44 = vpop.f32.mrf.mxu0 }
0x1416   :  { %v827_v46 = vpop.f32.mrf.mxu1 }
0x1417   :  { %v828_v47 = vadd.f32 %v827_v46, %v813_v45 }
0x1419   :  { %832 = vst.msk [vmem:[%s1223_s12] sm:$0x3] %vm831_vm6, %v828_v47 }
0x141e   :  { %v829_v48 = vpop.f32.mrf.mxu1 }

</bundles_post_ra>
